<compile_context>
chip_gen: v7x
topology: tpu7x:2x2x1
jax: 0.10.0
libtpu: 0.0.40
codegen_flags: <defaults>
</compile_context>

<pallas_src>
import functools
import math

import jax
import jax.numpy as jnp
from jax.experimental import pallas as pl
from jax.experimental.pallas import tpu as pltpu


def _patch_embed_kernel(x_ref, w_ref, o_ref, *, patch_len, stride, num_patches,
                        d_model):
    """One grid step: (TB, L_pad) bf16 series -> (TB, P*d_model) embeddings.

    pad + unfold + circular 3-tap conv are fully fused: the overlapping patch
    windows are static lane slices of the VMEM-resident series block (no HBM
    materialization of the unfolded patches), and the circular boundary of the
    conv over the patch axis is handled with static indices ((p +/- 1) % P), so
    no roll / iota / select / concat is needed at all.
    """
    P, PL, D = num_patches, patch_len, d_model
    x = x_ref[...]                                   # (TB, L_pad) bf16
    w0, w1, w2 = w_ref[0], w_ref[1], w_ref[2]        # (PL, D) bf16 taps k=0,1,2

    # Overlapping patch windows: static lane slices of the series block.
    patches = [x[:, p * stride: p * stride + PL] for p in range(P)]

    # TODO(synk): for very large P (long series / tiny stride) switch this static
    # unroll to a lax.fori_loop with pl.ds starts to bound compile time.
    for p in range(P):
        # y[p] = x[(p-1)%P] @ W0 + x[p] @ W1 + x[(p+1)%P] @ W2   (circular conv)
        acc = jnp.dot(patches[(p - 1) % P], w0, preferred_element_type=jnp.float32)
        acc += jnp.dot(patches[p], w1, preferred_element_type=jnp.float32)
        acc += jnp.dot(patches[(p + 1) % P], w2, preferred_element_type=jnp.float32)
        # All P patches of one series share one output row -> P*d_model lanes per
        # row: lane-dense HBM writeback when P*d_model >= 128 (exactly 128 here).
        o_ref[:, p * D:(p + 1) * D] = acc.astype(o_ref.dtype)


def _round_up(v, m):
    return -(-v // m) * m


def _pick_series_per_block(n_series, num_patches, d_model, out_itemsize):
    """Series per grid step.

    Priorities (in order): divides n_series with a legal BlockSpec (rows % 8 == 0
    or full array); grid >= 2 and even (both v7x TensorCores, balanced); rows %
    16 == 0 (bf16 sublane packing at block edges); <= ~4 MiB of output per block
    (amortizes per-step overhead, VMEM-safe double-buffered on v7x's 64 MiB);
    then the biggest such block.
    """
    target_bytes = 4 * 1024 * 1024
    per_series_out = max(1, num_patches * d_model * out_itemsize)
    tb_cap = max(1, target_bytes // per_series_out)
    divisors = [t for t in range(1, n_series + 1) if n_series % t == 0]
    legal = [t for t in divisors if t % 8 == 0 or t == n_series] or [n_series]

    def key(t):
        g = n_series // t
        return (
            g >= 2,                     # keep both v7x TensorCores busy
            g % 2 == 0,                 # even split across the 2 TCs
            t % 16 == 0,                # bf16 (16, 128) tile alignment
            t <= tb_cap,                # block-size sweet spot
            t if t <= tb_cap else -t,   # biggest under cap, else smallest over
        )

    return max(legal, key=key)


def _vmem_limit_bytes(tb, l_pad, p_d, out_itemsize):
    """Tiled, double-buffered footprint with 4x headroom; capped at 48 MiB so a
    tiling that is comfortable on v5e/v6e (128 MiB VMEM) stays safe on v7x
    (64 MiB physical).  On v5e/v6e this could be raised further if blocks grow."""
    in_block = _round_up(tb, 16) * _round_up(l_pad, 128) * 2          # bf16 tiles
    out_block = _round_up(tb, 8) * _round_up(p_d, 128) * max(out_itemsize, 2)
    need = 2 * in_block + 2 * out_block
    return int(min(48 * 1024 * 1024, max(32 * 1024 * 1024, 4 * need)))


def _patch_conv_pallas(series, w3, *, patch_len, stride, num_patches,
                       series_per_block, out_dtype):
    """series: (n_series, L_pad) bf16, w3: (3, patch_len, d_model) bf16.

    Returns (n_series, num_patches*d_model) in out_dtype.
    """
    n_series, l_pad = series.shape
    _, _, d_model = w3.shape
    assert n_series % series_per_block == 0
    grid = n_series // series_per_block
    p_d = num_patches * d_model

    kernel = functools.partial(_patch_embed_kernel, patch_len=patch_len,
                               stride=stride, num_patches=num_patches,
                               d_model=d_model)
    return pl.pallas_call(
        kernel,
        out_shape=jax.ShapeDtypeStruct((n_series, p_d), out_dtype),
        grid_spec=pltpu.PrefetchScalarGridSpec(
            num_scalar_prefetch=0,
            grid=(grid,),
            in_specs=[
                # big series slab per step (fused pad+unfold happens in-kernel)
                pl.BlockSpec((series_per_block, l_pad), lambda i: (i, 0)),
                # tiny per-tap weights: full array, constant index map -> resident
                pl.BlockSpec((3, patch_len, d_model), lambda i: (0, 0, 0)),
            ],
            out_specs=pl.BlockSpec((series_per_block, p_d), lambda i: (i, 0)),
        ),
        compiler_params=pltpu.CompilerParams(
            dimension_semantics=("parallel",),
            vmem_limit_bytes=_vmem_limit_bytes(
                series_per_block, l_pad, p_d, jnp.dtype(out_dtype).itemsize),
        ),
    )(series, w3)


@functools.partial(jax.jit,
                   static_argnames=("patch_len", "stride", "d_model", "out_dtype"))
def _patch_embedding_forward(x, w3, *, patch_len, stride, d_model, out_dtype):
    B, L, C = x.shape
    P = (L + stride - patch_len) // stride + 1       # num patches (as torch unfold)
    L_pad = (P - 1) * stride + patch_len             # last patch end (L < L_pad <= L+stride)
    # Channel-major + bf16 cast on the SMALL (B, L, C) array, before any expansion.
    series = jnp.reshape(jnp.transpose(x, (0, 2, 1)).astype(jnp.bfloat16), (B * C, L))
    # ReplicationPad1d((0, stride)): repeat last time step (only up to last patch end).
    series = jnp.concatenate(
        [series, jnp.broadcast_to(series[:, L - 1:L], (B * C, L_pad - L))], axis=-1)

    tb = _pick_series_per_block(B * C, P, d_model, jnp.dtype(out_dtype).itemsize)
    out = _patch_conv_pallas(series, w3, patch_len=patch_len, stride=stride,
                             num_patches=P, series_per_block=tb,
                             out_dtype=out_dtype)                   # (B*C, P*D)
    return jnp.reshape(out, (B * C, P, d_model))                    # free reshape


class PatchEmbeddingPallas:
    """JAX/Pallas re-implementation of the PyTorch PatchEmbedding module."""

    def __init__(self, d_model, patch_len, stride, dropout, key,
                 out_dtype=jnp.float32):
        self.d_model = d_model
        self.patch_len = patch_len
        self.stride = stride
        self.dropout = dropout        # TODO(synk): dropout applied as identity (eval mode)
        # f32 default matches torch; bf16 halves the dominant HBM write stream if
        # the downstream consumer tolerates it.
        self.out_dtype = out_dtype

        # Conv1d weight, torch shape (d_model, patch_len, 3); kaiming_normal_
        # (fan_in, leaky_relu a=0): std = sqrt(2 / (3*patch_len)).
        std = math.sqrt(2.0 / (3.0 * patch_len))
        w_torch = std * jax.random.normal(key, (d_model, patch_len, 3),
                                          dtype=jnp.float32)
        # Per-tap weights: w3[k, c, d] == w_torch[d, c, k]; taps 0/1/2 multiply the
        # previous / center / next patch of the circular conv.
        self.weight = jnp.transpose(w_torch, (2, 1, 0))        # (3, PL, D) f32 master
        self.weight_bf16 = self.weight.astype(jnp.bfloat16)    # kernel operand

    def __call__(self, x):
        B, L, C = x.shape
        out = _patch_embedding_forward(
            x, self.weight_bf16, patch_len=self.patch_len, stride=self.stride,
            d_model=self.d_model, out_dtype=self.out_dtype)
        return out, C


if __name__ == "__main__":
    key = jax.random.PRNGKey(0)
    k_w, k_x = jax.random.split(key)

    # Small shapes; B*n_vars = 32 series so the grid splits into >= 2 blocks.
    B, L, n_vars = 4, 32, 8
    d_model, patch_len, stride, dropout = 32, 16, 8, 0.1

    module = PatchEmbeddingPallas(d_model, patch_len, stride, dropout, k_w)
    x = jax.random.normal(k_x, (B, L, n_vars), dtype=jnp.float32)

    out, nv = module(x)
    out = jax.block_until_ready(out)

    # ---- pure-JAX reference of the torch semantics (pad -> unfold -> circular conv) ----
    P = (L + stride - patch_len) // stride + 1
    xp = jnp.transpose(x, (0, 2, 1))                                   # (B, C, L)
    x_pad = jnp.concatenate(
        [xp, jnp.repeat(xp[:, :, -1:], stride, axis=-1)], axis=-1)     # ReplicationPad1d
    idx = jnp.arange(P)[:, None] * stride + jnp.arange(patch_len)[None, :]
    x_patches = jnp.reshape(x_pad[:, :, idx], (B * n_vars, P, patch_len))
    # same bf16 operand quantization as the kernel, products/accumulation in f32
    xq = x_patches.astype(jnp.bfloat16).astype(jnp.float32)
    w3 = module.weight_bf16.astype(jnp.float32)                        # (3, PL, D)
    x_prev = jnp.roll(xq, 1, axis=1)
    x_next = jnp.roll(xq, -1, axis=1)
    hp = jax.lax.Precision.HIGHEST
    ref = (jnp.einsum('bpc,cd->bpd', x_prev, w3[0], precision=hp)
           + jnp.einsum('bpc,cd->bpd', xq, w3[1], precision=hp)
           + jnp.einsum('bpc,cd->bpd', x_next, w3[2], precision=hp))

    assert out.shape == (B * n_vars, P, d_model), out.shape
    assert nv == n_vars
    max_err = float(jnp.max(jnp.abs(out - ref)))
    assert jnp.allclose(out, ref, atol=2e-3, rtol=2e-3), max_err

    # Configurable output dtype (perf option): bf16 halves the dominant HBM write.
    module_bf16 = PatchEmbeddingPallas(d_model, patch_len, stride, dropout, k_w,
                                       out_dtype=jnp.bfloat16)
    out_bf16, _ = module_bf16(x)
    out_bf16 = jax.block_until_ready(out_bf16)
    assert out_bf16.dtype == jnp.bfloat16
    assert jnp.allclose(out_bf16.astype(jnp.float32), ref, atol=5e-2, rtol=5e-2)

    print("KERNEL_OK")
</pallas_src>

<mosaic_0001>
module attributes {stable_mosaic.version = 11 : i64} {
  func.func @_patch_embed_kernel(%arg0: i32, %arg1: memref<16x40xbf16, #tpu.memory_space<vmem>>, %arg2: memref<3x16x32xbf16, #tpu.memory_space<vmem>>, %arg3: memref<16x128xf32, #tpu.memory_space<vmem>>) attributes {dimension_semantics = [#tpu.dimension_semantics<parallel>], iteration_bounds = array<i64: 2>, scalar_prefetch = 0 : i64, scratch_operands = 0 : i64, tpu.core_type = #tpu.core_type<tc>, window_params = [{transform_indices = @transform_0, window_bounds = array<i64: 16, 40>}, {pipeline_mode = #tpu.pipeline_mode<synchronous>, transform_indices = @transform_1, window_bounds = array<i64: 3, 16, 32>}, {transform_indices = @transform_2, window_bounds = array<i64: 16, 128>}]} {
    %c0 = arith.constant 0 : index
    %c0_0 = arith.constant 0 : index
    %0 = vector.load %arg1[%c0, %c0_0] : memref<16x40xbf16, #tpu.memory_space<vmem>>, vector<16x40xbf16>
    %c0_1 = arith.constant 0 : index
    %c0_2 = arith.constant 0 : index
    %c0_3 = arith.constant 0 : index
    %1 = vector.load %arg2[%c0_1, %c0_2, %c0_3] : memref<3x16x32xbf16, #tpu.memory_space<vmem>>, vector<1x16x32xbf16>
    %2 = vector.shape_cast %1 : vector<1x16x32xbf16> to vector<16x32xbf16>
    %c1 = arith.constant 1 : index
    %c0_4 = arith.constant 0 : index
    %c0_5 = arith.constant 0 : index
    %3 = vector.load %arg2[%c1, %c0_4, %c0_5] : memref<3x16x32xbf16, #tpu.memory_space<vmem>>, vector<1x16x32xbf16>
    %4 = vector.shape_cast %3 : vector<1x16x32xbf16> to vector<16x32xbf16>
    %c2 = arith.constant 2 : index
    %c0_6 = arith.constant 0 : index
    %c0_7 = arith.constant 0 : index
    %5 = vector.load %arg2[%c2, %c0_6, %c0_7] : memref<3x16x32xbf16, #tpu.memory_space<vmem>>, vector<1x16x32xbf16>
    %6 = vector.shape_cast %5 : vector<1x16x32xbf16> to vector<16x32xbf16>
    %7 = vector.extract_strided_slice %0 {offsets = [0, 0], sizes = [16, 16], strides = [1, 1]} : vector<16x40xbf16> to vector<16x16xbf16>
    %8 = vector.extract_strided_slice %0 {offsets = [0, 8], sizes = [16, 16], strides = [1, 1]} : vector<16x40xbf16> to vector<16x16xbf16>
    %9 = vector.extract_strided_slice %0 {offsets = [0, 16], sizes = [16, 16], strides = [1, 1]} : vector<16x40xbf16> to vector<16x16xbf16>
    %10 = vector.extract_strided_slice %0 {offsets = [0, 24], sizes = [16, 16], strides = [1, 1]} : vector<16x40xbf16> to vector<16x16xbf16>
    %cst = arith.constant dense<0.000000e+00> : vector<16x32xf32>
    %11 = tpu.matmul %10, %2, %cst {dimension_numbers = #tpu.dot_dimension_numbers<[1], [0], [0], [1], [0, 0, 1, 1], [], []>} : vector<16x16xbf16>, vector<16x32xbf16>, vector<16x32xf32> -> vector<16x32xf32>
    %cst_8 = arith.constant dense<0.000000e+00> : vector<16x32xf32>
    %12 = tpu.matmul %7, %4, %cst_8 {dimension_numbers = #tpu.dot_dimension_numbers<[1], [0], [0], [1], [0, 0, 1, 1], [], []>} : vector<16x16xbf16>, vector<16x32xbf16>, vector<16x32xf32> -> vector<16x32xf32>
    %13 = arith.addf %11, %12 : vector<16x32xf32>
    %cst_9 = arith.constant dense<0.000000e+00> : vector<16x32xf32>
    %14 = tpu.matmul %8, %6, %cst_9 {dimension_numbers = #tpu.dot_dimension_numbers<[1], [0], [0], [1], [0, 0, 1, 1], [], []>} : vector<16x16xbf16>, vector<16x32xbf16>, vector<16x32xf32> -> vector<16x32xf32>
    %15 = arith.addf %13, %14 : vector<16x32xf32>
    %c0_10 = arith.constant 0 : index
    %c0_11 = arith.constant 0 : index
    %16 = vector.load %arg3[%c0_10, %c0_11] : memref<16x128xf32, #tpu.memory_space<vmem>>, vector<16x32xf32>
    tpu.vector_store %arg3[%c0_10, %c0_11], %15 {strides = array<i32>} : memref<16x128xf32, #tpu.memory_space<vmem>>, vector<16x32xf32>,
    %cst_12 = arith.constant dense<0.000000e+00> : vector<16x32xf32>
    %17 = tpu.matmul %7, %2, %cst_12 {dimension_numbers = #tpu.dot_dimension_numbers<[1], [0], [0], [1], [0, 0, 1, 1], [], []>} : vector<16x16xbf16>, vector<16x32xbf16>, vector<16x32xf32> -> vector<16x32xf32>
    %cst_13 = arith.constant dense<0.000000e+00> : vector<16x32xf32>
    %18 = tpu.matmul %8, %4, %cst_13 {dimension_numbers = #tpu.dot_dimension_numbers<[1], [0], [0], [1], [0, 0, 1, 1], [], []>} : vector<16x16xbf16>, vector<16x32xbf16>, vector<16x32xf32> -> vector<16x32xf32>
    %19 = arith.addf %17, %18 : vector<16x32xf32>
    %cst_14 = arith.constant dense<0.000000e+00> : vector<16x32xf32>
    %20 = tpu.matmul %9, %6, %cst_14 {dimension_numbers = #tpu.dot_dimension_numbers<[1], [0], [0], [1], [0, 0, 1, 1], [], []>} : vector<16x16xbf16>, vector<16x32xbf16>, vector<16x32xf32> -> vector<16x32xf32>
    %21 = arith.addf %19, %20 : vector<16x32xf32>
    %c0_15 = arith.constant 0 : index
    %c32 = arith.constant 32 : index
    %22 = vector.load %arg3[%c0_15, %c32] : memref<16x128xf32, #tpu.memory_space<vmem>>, vector<16x32xf32>
    tpu.vector_store %arg3[%c0_15, %c32], %21 {strides = array<i32>} : memref<16x128xf32, #tpu.memory_space<vmem>>, vector<16x32xf32>,
    %cst_16 = arith.constant dense<0.000000e+00> : vector<16x32xf32>
    %23 = tpu.matmul %8, %2, %cst_16 {dimension_numbers = #tpu.dot_dimension_numbers<[1], [0], [0], [1], [0, 0, 1, 1], [], []>} : vector<16x16xbf16>, vector<16x32xbf16>, vector<16x32xf32> -> vector<16x32xf32>
    %cst_17 = arith.constant dense<0.000000e+00> : vector<16x32xf32>
    %24 = tpu.matmul %9, %4, %cst_17 {dimension_numbers = #tpu.dot_dimension_numbers<[1], [0], [0], [1], [0, 0, 1, 1], [], []>} : vector<16x16xbf16>, vector<16x32xbf16>, vector<16x32xf32> -> vector<16x32xf32>
    %25 = arith.addf %23, %24 : vector<16x32xf32>
    %cst_18 = arith.constant dense<0.000000e+00> : vector<16x32xf32>
    %26 = tpu.matmul %10, %6, %cst_18 {dimension_numbers = #tpu.dot_dimension_numbers<[1], [0], [0], [1], [0, 0, 1, 1], [], []>} : vector<16x16xbf16>, vector<16x32xbf16>, vector<16x32xf32> -> vector<16x32xf32>
    %27 = arith.addf %25, %26 : vector<16x32xf32>
    %c0_19 = arith.constant 0 : index
    %c64 = arith.constant 64 : index
    %28 = vector.load %arg3[%c0_19, %c64] : memref<16x128xf32, #tpu.memory_space<vmem>>, vector<16x32xf32>
    tpu.vector_store %arg3[%c0_19, %c64], %27 {strides = array<i32>} : memref<16x128xf32, #tpu.memory_space<vmem>>, vector<16x32xf32>,
    %cst_20 = arith.constant dense<0.000000e+00> : vector<16x32xf32>
    %29 = tpu.matmul %9, %2, %cst_20 {dimension_numbers = #tpu.dot_dimension_numbers<[1], [0], [0], [1], [0, 0, 1, 1], [], []>} : vector<16x16xbf16>, vector<16x32xbf16>, vector<16x32xf32> -> vector<16x32xf32>
    %cst_21 = arith.constant dense<0.000000e+00> : vector<16x32xf32>
    %30 = tpu.matmul %10, %4, %cst_21 {dimension_numbers = #tpu.dot_dimension_numbers<[1], [0], [0], [1], [0, 0, 1, 1], [], []>} : vector<16x16xbf16>, vector<16x32xbf16>, vector<16x32xf32> -> vector<16x32xf32>
    %31 = arith.addf %29, %30 : vector<16x32xf32>
    %cst_22 = arith.constant dense<0.000000e+00> : vector<16x32xf32>
    %32 = tpu.matmul %7, %6, %cst_22 {dimension_numbers = #tpu.dot_dimension_numbers<[1], [0], [0], [1], [0, 0, 1, 1], [], []>} : vector<16x16xbf16>, vector<16x32xbf16>, vector<16x32xf32> -> vector<16x32xf32>
    %33 = arith.addf %31, %32 : vector<16x32xf32>
    %c0_23 = arith.constant 0 : index
    %c96 = arith.constant 96 : index
    %34 = vector.load %arg3[%c0_23, %c96] : memref<16x128xf32, #tpu.memory_space<vmem>>, vector<16x32xf32>
    tpu.vector_store %arg3[%c0_23, %c96], %33 {strides = array<i32>} : memref<16x128xf32, #tpu.memory_space<vmem>>, vector<16x32xf32>,
    return
  }
  func.func @transform_0(%arg0: i32) -> (i32, i32) {
    %c0_i32 = arith.constant 0 : i32
    %c0_i32_0 = arith.constant 0 : i32
    return %arg0, %c0_i32 : i32, i32
  }
  func.func @transform_1(%arg0: i32) -> (i32, i32, i32) {
    %c0_i32 = arith.constant 0 : i32
    %c0_i32_0 = arith.constant 0 : i32
    %c0_i32_1 = arith.constant 0 : i32
    %c0_i32_2 = arith.constant 0 : i32
    return %c0_i32, %c0_i32_0, %c0_i32_1 : i32, i32, i32
  }
  func.func @transform_2(%arg0: i32) -> (i32, i32) {
    %c0_i32 = arith.constant 0 : i32
    %c0_i32_0 = arith.constant 0 : i32
    return %arg0, %c0_i32 : i32, i32
  }
}

</mosaic_0001>

<bundles_post_ra>
// kernel: _patch_embedding_forward.1
= control target key start
LH: loop header
LB: loop body
LE: loop exit
PB: predicated region body
PF: predicated region fallthrough
CT: control target
= control target key end

     0   :  { %s1002_s9 = smov 0   ;;  %s1090_s0 = inlined_call_operand.vmem [shape: bf16[32,40], index: 0, kind: input, shape index: {}]   ;;  %s1091_s1 = inlined_call_operand.vmem [shape: bf16[3,16,32], index: 1, kind: input, shape index: {}]   ;;  %s1092_s2 = inlined_call_operand.vmem [shape: f32[32,128], index: 2, kind: output, shape index: {}]  }
   0x1 LB: > { %s792_s10 = sadd.s32 4294967295, %s977_s9   ;;  %p796_p0 = scmp.ge.s32.totalorder %s977_s9, 1  ;;  %s977_s9 = sphi %s1002_s9, %s12_s9  }
   0x2   : > { %p113_p1 = scmp.lt.s32.totalorder %s977_s9, 3 }
   0x4   : > { %p114_p2 = pnand %p796_p0, %p113_p1 }
   0x5   : > { %s797_s11 = sshll.u32 (!%p114_p2), %s792_s10, 1  ;;  %v968_v0 = vld [vmem:[%s1091_s1 + $0x8] sm:$0xff] (!%p114_p2)   ;;  %v979_v1 = vmov (!%p114_p2), 0.0   ;;  %vm980_vm0 = vmmov (!%p114_p2), 0   ;;  %v969_v2 = vld [vmem:[%s1091_s1] sm:$0xff] (!%p114_p2)   ;;  %vm169_vm1 = vcmask (!%p114_p2), 130048  }
   0x6   : > { %117 = sbr.rel (%p114_p2) target bundleno = 518 (0x206), region = 28  ;;  %p136_p3 = scmp.lt.s32.totalorder (!%p114_p2), %s797_s11, 3  ;;  %847 = vmatprep.subr.bf16.mxu0 (!%p114_p2), %v979_v1  ;;  %865 = vmatprep.subr.bf16.mxu1 (!%p114_p2), %v979_v1  ;;  %v970_v5 = vld [vmem:[%s1091_s1 + $0x10] sm:$0xff] (!%p114_p2)   ;;  %vm320_vm2 = vcmask (!%p114_p2), 261120   ;;  %vm461_vm3 = vcmask (!%p114_p2), 523520   ;;  %vm597_vm4 = vcmask (!%p114_p2), 785920  }
   0x7   : > { %848 = vmatpush3.bf16.msra.mxu0 (!%p114_p2), %v968_v0  ;;  %849 = vmatprep.mubr.msk.bf16.mxu0 (!%p114_p2), %vm980_vm0, %v979_v1  ;;  %s981_s20 = smov (!%p114_p2), 120   ;;  %s982_s21 = smov (!%p114_p2), 112   ;;  %vm733_vm5 = vcmask (!%p114_p2), 1048320  }
   0x8   : > { %853 = vmatprep.subr.bf16.mxu0 (!%p114_p2), %v979_v1  ;;  %866 = vmatpush3.bf16.msra.mxu1 (!%p114_p2), %v968_v0  ;;  %s983_s22 = smov (!%p114_p2), 104   ;;  %s984_s29 = smov (!%p114_p2), 32  }
   0x9   : > { %867 = vmatprep.mubr.msk.bf16.mxu1 (!%p114_p2), %vm980_vm0, %v979_v1  ;;  %871 = vmatprep.subr.bf16.mxu1 (!%p114_p2), %v979_v1  ;;  %s985_s30 = smov (!%p114_p2), 64   ;;  %s986_s3 = smov (!%p114_p2), 96  }
   0xd   : > { %s1094_s11 = smov (!%p136_p3, %s797_s11), 3 }
   0xe   : > { %s798_s14 = sshll.u32 %s1094_s11, 2  ;;  %s800_s25 = sshll.u32 %s1094_s11, 3 }
   0xf   : > { %s139_s17 = scalar_lea.vmem %s1090_s0, %s798_s14  ;;  %s1077_s28 = scalar_lea.vmem %s1092_s2, %s800_s25 }
  0x10   : > { %v967_v3 = vld [vmem:[%s139_s17] sm:$0xff]  }
  0x11   : > { %266 = vrot.lane.b32.xlu0 %v967_v3, %s981_s20  ;;  %405 = vrot.lane.b32.xlu1 %v967_v3, %s982_s21 }
  0x12   : > { %850 = vmatmul.mubr.msk.bf16.vlgmr.msra.gmra.mrb[0].mxu0 %vm169_vm1, %v967_v3 }
  0x13   : > { %854 = vmatpush3.bf16.msra.mxu0 %v969_v2  ;;  %855 = vmatprep.mubr.msk.bf16.mxu0 %vm980_vm0, %v979_v1 }
  0x14   : > { %859 = vmatprep.subr.bf16.mxu0 %v979_v1 }
  0x15   : > { %214 = vrot.lane.b32.xlu0 %v967_v3, %s983_s22 }
  0x83   : > { %v267_v4 = vpop.permute.xlu0 %266  ;;  %v406_v7 = vpop.permute.xlu1 %405 }
  0x84   : > { %868 = vmatmul.mubr.msk.bf16.vlgmr.msra.gmra.mrb[0].mxu1 %vm169_vm1, %v267_v4 }
  0x85   : > { %872 = vmatpush3.bf16.msra.mxu1 %v969_v2  ;;  %873 = vmatprep.mubr.msk.bf16.mxu1 %vm980_vm0, %v979_v1 }
  0x86   : > { %877 = vmatprep.subr.bf16.mxu1 %v979_v1 }
  0x87   : > { %v215_v6 = vpop.permute.xlu0 %214 }
  0x88   : > { %856 = vmatmul.mubr.msk.bf16.vlgmr.msra.gmra.mrb[0].mxu0 %vm169_vm1, %v215_v6 }
  0x89   : > { %860 = vmatpush3.bf16.msra.mxu0 %v970_v5  ;;  %861 = vmatprep.mubr.msk.bf16.mxu0 %vm980_vm0, %v979_v1 }
  0x8a   : > { %883 = vmatprep.subr.bf16.mxu0 %v979_v1 }
  0x90   : > { %874 = vmatmul.mubr.msk.bf16.vlgmr.msra.gmra.mrb[0].mxu1 %vm169_vm1, %v967_v3 }
  0x91   : > { %878 = vmatpush3.bf16.msra.mxu1 %v970_v5  ;;  %879 = vmatprep.mubr.msk.bf16.mxu1 %vm980_vm0, %v979_v1 }
  0x92   : > { %901 = vmatprep.subr.bf16.mxu1 %v979_v1 }
  0x94   : > { %862 = vmatmul.mubr.msk.bf16.vlgmr.msra.gmra.mrb[0].mxu0 %vm169_vm1, %v267_v4 }
  0x95   : > { %884 = vmatpush3.bf16.msra.mxu0 %v968_v0  ;;  %885 = vmatprep.mubr.msk.bf16.mxu0 %vm980_vm0, %v979_v1 }
  0x96   : > { %889 = vmatprep.subr.bf16.mxu0 %v979_v1 }
  0x9c   : > { %880 = vmatmul.mubr.msk.bf16.vlgmr.msra.gmra.mrb[0].mxu1 %vm169_vm1, %v406_v7  ;;  %886 = vmatmul.mubr.msk.bf16.vlgmr.msra.gmra.mrb[4].mxu0 %vm169_vm1, %v406_v7 }
  0x9d   : > { %902 = vmatpush3.bf16.msra.mxu1 %v968_v0  ;;  %890 = vmatpush3.bf16.msra.mxu0 %v969_v2 }
  0x9e   : > { %903 = vmatprep.mubr.msk.bf16.mxu1 %vm980_vm0, %v979_v1  ;;  %907 = vmatprep.subr.bf16.mxu1 %v979_v1 }
  0x9f   : > { %891 = vmatprep.mubr.msk.bf16.mxu0 %vm980_vm0, %v979_v1  ;;  %895 = vmatprep.subr.bf16.mxu0 %v979_v1 }
  0xa4   : > { %904 = vmatmul.mubr.msk.bf16.vlgmr.msra.gmra.mrb[4].mxu1 %vm169_vm1, %v215_v6 }
  0xa5   : > { %908 = vmatpush3.bf16.msra.mxu1 %v969_v2  ;;  %909 = vmatprep.mubr.msk.bf16.mxu1 %vm980_vm0, %v979_v1 }
  0xa6   : > { %913 = vmatprep.subr.bf16.mxu1 %v979_v1 }
  0xa8   : > { %892 = vmatmul.mubr.msk.bf16.vlgmr.msra.gmra.mrb[4].mxu0 %vm169_vm1, %v267_v4 }
  0xa9   : > { %896 = vmatpush3.bf16.msra.mxu0 %v970_v5  ;;  %897 = vmatprep.mubr.msk.bf16.mxu0 %vm980_vm0, %v979_v1 }
  0xb0   : > { %910 = vmatmul.mubr.msk.bf16.vlgmr.msra.gmra.mrb[4].mxu1 %vm169_vm1, %v406_v7 }
  0xb1   : > { %914 = vmatpush3.bf16.msra.mxu1 %v970_v5  ;;  %915 = vmatprep.mubr.msk.bf16.mxu1 %vm980_vm0, %v979_v1 }
  0xb4   : > { %898 = vmatmul.mubr.msk.bf16.vlgmr.msra.gmra.mrb[4].mxu0 %vm169_vm1, %v215_v6 }
  0xbc   : > { %916 = vmatmul.mubr.msk.bf16.vlgmr.msra.gmra.mrb[4].mxu1 %vm169_vm1, %v967_v3 }
 0x167   : > { %v311_v8 = vpop.f32.mrb[0].mxu0 }
 0x168   : > { %321 = vst.msk [vmem:[%s1077_s28] sm:$0xff] %vm320_vm2, %v311_v8  ;;  %v863_v9 = vpop.f32.mrb[1].mxu0 }
 0x169   : > { %v314_v10 = vpop.f32.mrb[2].mxu0 }
 0x16a   : > { %322 = vst.msk [vmem:[%s1077_s28 + $0x8] sm:$0xff] %vm320_vm2, %v314_v10  ;;  %v864_v11 = vpop.f32.mrb[3].mxu0 }
 0x16f   : > { %v444_v12 = vpop.f32.mrb[0].mxu1 }
 0x170   : > { %455 = vrot.lane.b32.xlu1 %v444_v12, %s984_s29  ;;  %v881_v13 = vpop.f32.mrb[1].mxu1 }
 0x171   : > { %v447_v14 = vpop.f32.mrb[2].mxu1 }
 0x172   : > { %457 = vrot.lane.b32.xlu0 %v447_v14, %s984_s29  ;;  %v882_v15 = vpop.f32.mrb[3].mxu1 }
 0x187   : > { %v580_v16 = vpop.f32.mrb[4].mxu0 }
 0x188   : > { %591 = vrot.lane.b32.xlu1 %v580_v16, %s985_s30  ;;  %v899_v17 = vpop.f32.mrb[5].mxu0 }
 0x189   : > { %v583_v18 = vpop.f32.mrb[6].mxu0 }
 0x18a   : > { %593 = vrot.lane.b32.xlu0 %v583_v18, %s985_s30  ;;  %v900_v19 = vpop.f32.mrb[7].mxu0 }
 0x18f   : > { %v716_v20 = vpop.f32.mrb[4].mxu1 }
 0x190   : > { %v917_v21 = vpop.f32.mrb[5].mxu1  ;;  %727 = vrot.lane.b32.xlu1 %v716_v20, %s986_s3 }
 0x191   : > { %v719_v22 = vpop.f32.mrb[6].mxu1 }
 0x192   : > { %v918_v23 = vpop.f32.mrb[7].mxu1  ;;  %729 = vrot.lane.b32.xlu0 %v719_v22, %s986_s3 }
 0x1e2   : > { %v456_v24 = vpop.permute.xlu1 %455 }
 0x1e3   : > { %462 = vst.msk [vmem:[%s1077_s28] sm:$0xff] %vm461_vm3, %v456_v24 }
 0x1e4   : > { %v458_v25 = vpop.permute.xlu0 %457 }
 0x1e5   : > { %463 = vst.msk [vmem:[%s1077_s28 + $0x8] sm:$0xff] %vm461_vm3, %v458_v25 }
 0x1fa   : > { %v592_v26 = vpop.permute.xlu1 %591 }
 0x1fb   : > { %598 = vst.msk [vmem:[%s1077_s28] sm:$0xff] %vm597_vm4, %v592_v26 }
 0x1fc   : > { %v594_v27 = vpop.permute.xlu0 %593 }
 0x1fd   : > { %599 = vst.msk [vmem:[%s1077_s28 + $0x8] sm:$0xff] %vm597_vm4, %v594_v27 }
 0x202   : > { %v728_v28 = vpop.permute.xlu1 %727 }
 0x203   : > { %734 = vst.msk [vmem:[%s1077_s28] sm:$0xff] %vm733_vm5, %v728_v28 }
 0x204   : > { %v730_v29 = vpop.permute.xlu0 %729 }
 0x205   : > { %735 = vst.msk [vmem:[%s1077_s28 + $0x8] sm:$0xff] %vm733_vm5, %v730_v29 }
 0x206 PF: > { %s12_s9 = sadd.s32 1, %s977_s9  }
 0x207   : > { %p9_p4 = scmp.ge.s32.totalorder %s12_s9, 4  }
 0x209   :  { %11 = sbr.rel (!%p9_p4) target bundleno = 1 (0x1), region = 60 }

</bundles_post_ra>
